<compile_context>
chip_gen: v6e
topology: v6e:2x2x1
jax: 0.10.0
libtpu: 0.0.40
codegen_flags: <defaults>
</compile_context>

<pallas_src>
import functools

import jax
import jax.numpy as jnp
from jax.experimental import pallas as pl
from jax.experimental.pallas import tpu as pltpu

IN_DIM = 600   # fce1 input features
H_DIM = 256    # fce1 output / fce2 input features
REP_DIM = 64   # fce2 output features (rep_dim)


def _round_up(a: int, m: int) -> int:
    return ((a + m - 1) // m) * m


def svdd_kernel(x_ref, w1_ref, w2_ref, o_ref):
    # x_ref : [tb, 600] f32      w1_ref : [600, 256] bf16
    # w2_ref: [256, 64] bf16     o_ref  : [tb, 64]   f32
    x = x_ref[...].astype(jnp.bfloat16)            # VPU cast, hidden under DMA
    h = jnp.dot(x, w1_ref[...], preferred_element_type=jnp.float32)
    h = jnp.maximum(h, 0.0)                        # ReLU 1 (VPU)
    y = jnp.dot(h.astype(jnp.bfloat16), w2_ref[...],
                preferred_element_type=jnp.float32)
    o_ref[...] = jnp.maximum(y, 0.0).astype(o_ref.dtype)   # ReLU 2 + store


def prepare_params(w1, w2):
    """One-time weight packing (outside the jitted forward): bf16 cast.

    Weights are stored as [in_features, out_features], i.e. the transpose of
    torch.nn.Linear.weight.
    """
    return w1.astype(jnp.bfloat16), w2.astype(jnp.bfloat16)


@functools.partial(jax.jit, static_argnames=("tb",))
def svdd_forward(x, w1_bf16, w2_bf16, *, tb=2048):
    """x: [B, 600] f32; w1_bf16: [600, 256] bf16; w2_bf16: [256, 64] bf16
    -> [B, 64] f32."""
    B = x.shape[0]

    # Batch tile: multiple of 16 (bf16 sublane packing), clipped to B.
    tb_eff = _round_up(min(tb, max(B, 1)), 16)
    grid = (pl.cdiv(B, tb_eff),)

    flops = 2 * B * (IN_DIM * H_DIM + H_DIM * REP_DIM)
    bytes_accessed = (B * IN_DIM * 4 + B * REP_DIM * 4
                      + IN_DIM * H_DIM * 2 + H_DIM * REP_DIM * 2)

    return pl.pallas_call(
        svdd_kernel,
        out_shape=jax.ShapeDtypeStruct((B, REP_DIM), jnp.float32),
        grid_spec=pltpu.PrefetchScalarGridSpec(
            num_scalar_prefetch=0,
            grid=grid,
            in_specs=[
                # Batch-tiled activations (unpadded, partial last block OK —
                # no cross-row reduction, clipped on writeback).
                pl.BlockSpec((tb_eff, IN_DIM), lambda i: (i, 0)),
                # Weights resident across all grid steps.
                pl.BlockSpec((IN_DIM, H_DIM), lambda i: (0, 0)),
                pl.BlockSpec((H_DIM, REP_DIM), lambda i: (0, 0)),
            ],
            out_specs=pl.BlockSpec((tb_eff, REP_DIM), lambda i: (i, 0)),
        ),
        compiler_params=pltpu.CompilerParams(
            dimension_semantics=("parallel",),
            vmem_limit_bytes=32 << 20),
        cost_estimate=pl.CostEstimate(
            flops=flops, transcendentals=0, bytes_accessed=bytes_accessed),
    )(x, w1_bf16, w2_bf16)


def reference_forward(x, w1, w2):
    """Pure-JAX reference with matching bf16 inputs / f32 accumulation."""
    h = jnp.maximum(
        jnp.dot(x.astype(jnp.bfloat16), w1.astype(jnp.bfloat16),
                preferred_element_type=jnp.float32), 0.0)
    y = jnp.maximum(
        jnp.dot(h.astype(jnp.bfloat16), w2.astype(jnp.bfloat16),
                preferred_element_type=jnp.float32), 0.0)
    return y


if __name__ == "__main__":
    key = jax.random.PRNGKey(0)
    kx, k1, k2 = jax.random.split(key, 3)

    B = 4  # small smoke-test batch; wrapper adapts tile size / partial block
    x = jax.random.normal(kx, (B, IN_DIM), dtype=jnp.float32)

    # Deterministic synthetic parameters (Kaiming-uniform-ish scale), stored
    # as [in, out] = transpose of PyTorch's nn.Linear weight [out, in].
    bound1 = 1.0 / jnp.sqrt(IN_DIM)
    bound2 = 1.0 / jnp.sqrt(H_DIM)
    w1 = jax.random.uniform(k1, (IN_DIM, H_DIM), jnp.float32, -bound1, bound1)
    w2 = jax.random.uniform(k2, (H_DIM, REP_DIM), jnp.float32, -bound2, bound2)

    # One-time weight packing outside the jitted forward.
    w1_bf16, w2_bf16 = prepare_params(w1, w2)

    out = svdd_forward(x, w1_bf16, w2_bf16)
    out = jax.block_until_ready(out)

    ref = reference_forward(x, w1, w2)
    assert out.shape == (B, REP_DIM)
    assert jnp.allclose(out, ref, atol=2e-2, rtol=2e-2), (
        float(jnp.max(jnp.abs(out - ref))))

    print("KERNEL_OK")
</pallas_src>

<mosaic_0001>
module attributes {stable_mosaic.version = 11 : i64} {
  func.func @svdd_kernel(%arg0: i32, %arg1: memref<16x600xf32, #tpu.memory_space<vmem>>, %arg2: memref<600x256xbf16, #tpu.memory_space<vmem>>, %arg3: memref<256x64xbf16, #tpu.memory_space<vmem>>, %arg4: memref<16x64xf32, #tpu.memory_space<vmem>>) attributes {dimension_semantics = [#tpu.dimension_semantics<parallel>], iteration_bounds = array<i64: 1>, scalar_prefetch = 0 : i64, scratch_operands = 0 : i64, tpu.core_type = #tpu.core_type<tc>, window_params = [{transform_indices = @transform_0, window_bounds = array<i64: 16, 600>}, {pipeline_mode = #tpu.pipeline_mode<synchronous>, transform_indices = @transform_1, window_bounds = array<i64: 600, 256>}, {pipeline_mode = #tpu.pipeline_mode<synchronous>, transform_indices = @transform_2, window_bounds = array<i64: 256, 64>}, {transform_indices = @transform_3, window_bounds = array<i64: 16, 64>}]} {
    %c0 = arith.constant 0 : index
    %c0_0 = arith.constant 0 : index
    %0 = vector.load %arg1[%c0, %c0_0] : memref<16x600xf32, #tpu.memory_space<vmem>>, vector<16x600xf32>
    %1 = arith.truncf %0 : vector<16x600xf32> to vector<16x600xbf16>
    %c0_1 = arith.constant 0 : index
    %c0_2 = arith.constant 0 : index
    %2 = vector.load %arg2[%c0_1, %c0_2] : memref<600x256xbf16, #tpu.memory_space<vmem>>, vector<600x256xbf16>
    %cst = arith.constant dense<0.000000e+00> : vector<16x256xf32>
    %3 = tpu.matmul %1, %2, %cst {dimension_numbers = #tpu.dot_dimension_numbers<[1], [0], [0], [1], [0, 0, 1, 1], [], []>} : vector<16x600xbf16>, vector<600x256xbf16>, vector<16x256xf32> -> vector<16x256xf32>
    %cst_3 = arith.constant 0.000000e+00 : f32
    %4 = vector.broadcast %cst_3 : f32 to vector<16x256xf32>
    %5 = arith.maximumf %3, %4 : vector<16x256xf32>
    %6 = arith.truncf %5 : vector<16x256xf32> to vector<16x256xbf16>
    %c0_4 = arith.constant 0 : index
    %c0_5 = arith.constant 0 : index
    %7 = vector.load %arg3[%c0_4, %c0_5] : memref<256x64xbf16, #tpu.memory_space<vmem>>, vector<256x64xbf16>
    %cst_6 = arith.constant dense<0.000000e+00> : vector<16x64xf32>
    %8 = tpu.matmul %6, %7, %cst_6 {dimension_numbers = #tpu.dot_dimension_numbers<[1], [0], [0], [1], [0, 0, 1, 1], [], []>} : vector<16x256xbf16>, vector<256x64xbf16>, vector<16x64xf32> -> vector<16x64xf32>
    %cst_7 = arith.constant 0.000000e+00 : f32
    %9 = vector.broadcast %cst_7 : f32 to vector<16x64xf32>
    %10 = arith.maximumf %8, %9 : vector<16x64xf32>
    %c0_8 = arith.constant 0 : index
    %c0_9 = arith.constant 0 : index
    %11 = vector.load %arg4[%c0_8, %c0_9] : memref<16x64xf32, #tpu.memory_space<vmem>>, vector<16x64xf32>
    tpu.vector_store %arg4[%c0_8, %c0_9], %10 {strides = array<i32>} : memref<16x64xf32, #tpu.memory_space<vmem>>, vector<16x64xf32>,
    return
  }
  func.func @transform_0(%arg0: i32) -> (i32, i32) {
    %c0_i32 = arith.constant 0 : i32
    %c0_i32_0 = arith.constant 0 : i32
    return %arg0, %c0_i32 : i32, i32
  }
  func.func @transform_1(%arg0: i32) -> (i32, i32) {
    %c0_i32 = arith.constant 0 : i32
    %c0_i32_0 = arith.constant 0 : i32
    %c0_i32_1 = arith.constant 0 : i32
    return %c0_i32, %c0_i32_0 : i32, i32
  }
  func.func @transform_2(%arg0: i32) -> (i32, i32) {
    %c0_i32 = arith.constant 0 : i32
    %c0_i32_0 = arith.constant 0 : i32
    %c0_i32_1 = arith.constant 0 : i32
    return %c0_i32, %c0_i32_0 : i32, i32
  }
  func.func @transform_3(%arg0: i32) -> (i32, i32) {
    %c0_i32 = arith.constant 0 : i32
    %c0_i32_0 = arith.constant 0 : i32
    return %arg0, %c0_i32 : i32, i32
  }
}

</mosaic_0001>

<bundles_post_ra>
// kernel: svdd_forward.1
= control target key start
LH: loop header
LB: loop body
LE: loop exit
PB: predicated region body
PF: predicated region fallthrough
CT: control target
= control target key end

     0   :  { %8 = vsyncpa [#allocation3], 0  ;;  %s1289_s0 = inlined_call_operand.vmem [shape: f32[4,600], index: 0, kind: input, shape index: {}]   ;;  %s1290_s1 = inlined_call_operand.hbm [shape: bf16[600,256], index: 1, kind: input, shape index: {}]   ;;  %s1291_s2 = inlined_call_operand.vmem [shape: bf16[256,64], index: 2, kind: input, shape index: {}]   ;;  %s1292_s3 = inlined_call_operand.hbm [shape: f32[4,64], index: 3, kind: output, shape index: {}]  }
   0x1   :  { %9 = vsyncpa [#allocation4], 0  ;;  %s1176_s12 = smov [#allocation2]  }
   0x2   :  { %s17_s13 = sshll.u32 %s1176_s12, 4  ;;  %s18_s13 = int_to_ptr.vmem [resolvable:$true] %s17_s13 }
   0x3   :  { %s1140_s14 = scalar_lea.vmem %s18_s13, 9600  ;;  %p1145_p1 = scmp.lt.s32.totalorder %s18_s13, %s18_s13 }
   0x4   :  { %p1141_p0 = scmp.ne.s32.totalorder %s18_s13, %s1140_s14  ;;  %p1146_p2 = scmp.lt.s32.totalorder %s1140_s14, %s1140_s14 }
   0x6   :  { %p1147_p3 = por %p1146_p2, %p1145_p1 }
   0x8   :  { %p1148_p4 = pnand %p1147_p3, %p1141_p0 }
   0xa   :  { %1151 = shalt.err (!%p1148_p4)
}
   0xb   :  { %s1177_s15 = smov 128   ;;  %s1178_s16 = smov 8  }
   0xc   :  { %23 = dma.hbm_to_vmem [thread:$0]  %s1290_s1, 9600, %s18_s13, [#allocation3], %s1177_s15, %s1177_s15, %s1178_s16  }
   0xd   :  { %1172 = dma.done.wait [#allocation3], 9600  }
   0xe   :  { %1173 = vsyncadd [#allocation3], 4294957696  ;;  %v989_v0 = vld [vmem:[#allocation2 + $0x74] ss:$8 sps:$4 sm:$0xff]   ;;  %v993_v2 = vld [vmem:[#allocation2 + $0x70] ss:$8 sps:$4 sm:$0xff]  }
   0xf   :  { %v991_v1 = vld [vmem:[#allocation2 + $0x174] ss:$8 sps:$4 sm:$0xff]   ;;  %540 = vmatprep.subr.bf16.mxu0 %v989_v0  ;;  %v994_v3 = vld [vmem:[#allocation2 + $0x170] ss:$8 sps:$4 sm:$0xff]   ;;  %v995_v4 = vld [vmem:[#allocation2 + $0x64] ss:$8 sps:$4 sm:$0xff]  }
  0x10   :  { %583 = vmatprep.subr.bf16.mxu1 %v991_v1  ;;  %541 = vmatpush1.bf16.msra.mxu0 %v993_v2  ;;  %v997_v5 = vld [vmem:[#allocation2 + $0x164] ss:$8 sps:$4 sm:$0xff]   ;;  %v999_v6 = vld [vmem:[#allocation2 + $0x60] ss:$8 sps:$4 sm:$0xff]   ;;  %v1001_v8 = vld [vmem:[#allocation2 + $0x54] ss:$8 sps:$4 sm:$0xff]  }
  0x11   :  { %584 = vmatpush1.bf16.msra.mxu1 %v994_v3  ;;  %542 = vmatprep.subr.bf16.mxu0 %v995_v4  ;;  %v1000_v7 = vld [vmem:[#allocation2 + $0x160] ss:$8 sps:$4 sm:$0xff]   ;;  %v1003_v9 = vld [vmem:[#allocation2 + $0x154] ss:$8 sps:$4 sm:$0xff]   ;;  %v1005_v10 = vld [vmem:[#allocation2 + $0x50] ss:$8 sps:$4 sm:$0xff]  }
  0x12   :  { %585 = vmatprep.subr.bf16.mxu1 %v997_v5  ;;  %v1006_v11 = vld [vmem:[#allocation2 + $0x150] ss:$8 sps:$4 sm:$0xff]   ;;  %v1007_v12 = vld [vmem:[#allocation2 + $0x44] ss:$8 sps:$4 sm:$0xff]   ;;  %v1011_v14 = vld [vmem:[#allocation2 + $0x40] ss:$8 sps:$4 sm:$0xff]  }
  0x13   :  { %v1009_v13 = vld [vmem:[#allocation2 + $0x144] ss:$8 sps:$4 sm:$0xff]   ;;  %v1012_v15 = vld [vmem:[#allocation2 + $0x140] ss:$8 sps:$4 sm:$0xff]   ;;  %v1013_v16 = vld [vmem:[#allocation2 + $0x34] ss:$8 sps:$4 sm:$0xff]  }
  0x14   :  { %543 = vmatpush1.bf16.msra.mxu0 %v999_v6  ;;  %v1015_v17 = vld [vmem:[#allocation2 + $0x134] ss:$8 sps:$4 sm:$0xff]   ;;  %v1017_v18 = vld [vmem:[#allocation2 + $0x30] ss:$8 sps:$4 sm:$0xff]   ;;  %v1019_v20 = vld [vmem:[#allocation2 + $0x24] ss:$8 sps:$4 sm:$0xff]  }
  0x15   :  { %586 = vmatpush1.bf16.msra.mxu1 %v1000_v7  ;;  %544 = vmatprep.subr.bf16.mxu0 %v1001_v8  ;;  %v1018_v19 = vld [vmem:[#allocation2 + $0x130] ss:$8 sps:$4 sm:$0xff]   ;;  %v1021_v21 = vld [vmem:[#allocation2 + $0x124] ss:$8 sps:$4 sm:$0xff]   ;;  %v1023_v22 = vld [vmem:[#allocation2 + $0x20] ss:$8 sps:$4 sm:$0xff]  }
  0x16   :  { %587 = vmatprep.subr.bf16.mxu1 %v1003_v9  ;;  %v1024_v23 = vld [vmem:[#allocation2 + $0x120] ss:$8 sps:$4 sm:$0xff]   ;;  %v1025_v24 = vld [vmem:[#allocation2 + $0x14] ss:$8 sps:$4 sm:$0xff]   ;;  %v1029_v26 = vld [vmem:[#allocation2 + $0x10] ss:$8 sps:$4 sm:$0xff]  }
  0x17   :  { %v1027_v25 = vld [vmem:[#allocation2 + $0x114] ss:$8 sps:$4 sm:$0xff]   ;;  %v1030_v27 = vld [vmem:[#allocation2 + $0x110] ss:$8 sps:$4 sm:$0xff]   ;;  %v1031_v28 = vld [vmem:[#allocation2 + $0x4] ss:$8 sps:$4 sm:$0xff]  }
  0x18   :  { %545 = vmatpush1.bf16.msra.mxu0 %v1005_v10  ;;  %v1033_v29 = vld [vmem:[#allocation2 + $0x104] ss:$8 sps:$4 sm:$0xff]   ;;  %v1035_v30 = vld [vmem:[#allocation2] ss:$8 sps:$4 sm:$0xff]   ;;  %v1037_v32 = vld [vmem:[#allocation2 + $0xf4] ss:$8 sps:$4 sm:$0xff]  }
  0x19   :  { %588 = vmatpush1.bf16.msra.mxu1 %v1006_v11  ;;  %546 = vmatprep.subr.bf16.mxu0 %v1007_v12  ;;  %v1036_v31 = vld [vmem:[#allocation2 + $0x100] ss:$8 sps:$4 sm:$0xff]   ;;  %v1039_v33 = vld [vmem:[#allocation2 + $0x1f4] ss:$8 sps:$4 sm:$0xff]   ;;  %v1041_v34 = vld [vmem:[#allocation2 + $0xf0] ss:$8 sps:$4 sm:$0xff]  }
  0x1a   :  { %589 = vmatprep.subr.bf16.mxu1 %v1009_v13  ;;  %v1042_v35 = vld [vmem:[#allocation2 + $0x1f0] ss:$8 sps:$4 sm:$0xff]   ;;  %v1043_v36 = vld [vmem:[#allocation2 + $0xe4] ss:$8 sps:$4 sm:$0xff]   ;;  %v1047_v38 = vld [vmem:[#allocation2 + $0xe0] ss:$8 sps:$4 sm:$0xff]  }
  0x1b   :  { %v1045_v37 = vld [vmem:[#allocation2 + $0x1e4] ss:$8 sps:$4 sm:$0xff]   ;;  %v1048_v39 = vld [vmem:[#allocation2 + $0x1e0] ss:$8 sps:$4 sm:$0xff]   ;;  %v1049_v40 = vld [vmem:[#allocation2 + $0xd4] ss:$8 sps:$4 sm:$0xff]  }
  0x1c   :  { %547 = vmatpush1.bf16.msra.mxu0 %v1011_v14  ;;  %v1051_v41 = vld [vmem:[#allocation2 + $0x1d4] ss:$8 sps:$4 sm:$0xff]   ;;  %v1053_v42 = vld [vmem:[#allocation2 + $0xd0] ss:$8 sps:$4 sm:$0xff]   ;;  %v1055_v44 = vld [vmem:[#allocation2 + $0xc4] ss:$8 sps:$4 sm:$0xff]  }
  0x1d   :  { %590 = vmatpush1.bf16.msra.mxu1 %v1012_v15  ;;  %548 = vmatprep.subr.bf16.mxu0 %v1013_v16  ;;  %v1054_v43 = vld [vmem:[#allocation2 + $0x1d0] ss:$8 sps:$4 sm:$0xff]   ;;  %v1057_v45 = vld [vmem:[#allocation2 + $0x1c4] ss:$8 sps:$4 sm:$0xff]   ;;  %v1059_v46 = vld [vmem:[#allocation2 + $0xc0] ss:$8 sps:$4 sm:$0xff]  }
  0x1e   :  { %591 = vmatprep.subr.bf16.mxu1 %v1015_v17  ;;  %v1060_v47 = vld [vmem:[#allocation2 + $0x1c0] ss:$8 sps:$4 sm:$0xff]   ;;  %v1061_v48 = vld [vmem:[#allocation2 + $0xb4] ss:$8 sps:$4 sm:$0xff]   ;;  %v1087_v50 = vld [vmem:[%s1289_s0 + $0x4] ss:$20 sps:$4 sm:$0xff]  }
  0x1f   :  { %v1063_v49 = vld [vmem:[#allocation2 + $0x1b4] ss:$8 sps:$4 sm:$0xff]   ;;  %v1090_v51 = vld [vmem:[%s1289_s0 + $0x2c] ss:$20 sps:$4 sm:$0xff]   ;;  %v1065_v52 = vld [vmem:[#allocation2 + $0xb0] ss:$8 sps:$4 sm:$0xff]  }
  0x20   :  { %549 = vmatpush1.bf16.msra.mxu0 %v1017_v18  ;;  %v1066_v53 = vld [vmem:[#allocation2 + $0x1b0] ss:$8 sps:$4 sm:$0xff]   ;;  %v75_v54 = vpack.c.bf16 %v1090_v51, %v1087_v50  ;;  %v1093_v55 = vld [vmem:[%s1289_s0 + $0xc] ss:$20 sps:$4 sm:$0xff]   ;;  %v1096_v56 = vld [vmem:[%s1289_s0 + $0x34] ss:$20 sps:$4 sm:$0xff]  }
  0x21   :  { %592 = vmatpush1.bf16.msra.mxu1 %v1018_v19  ;;  %550 = vmatprep.subr.bf16.mxu0 %v1019_v20  ;;  %v1067_v57 = vld [vmem:[#allocation2 + $0xa4] ss:$8 sps:$4 sm:$0xff]   ;;  %v77_v59 = vpack.c.bf16 %v1096_v56, %v1093_v55  ;;  %v153_v60 = vld [vmem:[#allocation2 + $0x250] sm:$0xff]  ;;  %v1071_v61 = vld [vmem:[#allocation2 + $0xa0] ss:$8 sps:$4 sm:$0xff]   ;;  %vm533_vm0 = vcmask 1043456  }
  0x22   :  { %593 = vmatprep.subr.bf16.mxu1 %v1021_v21  ;;  %v1069_v58 = vld [vmem:[#allocation2 + $0x1a4] ss:$8 sps:$4 sm:$0xff]   ;;  %572 = vmatprep.mubr.bf16.mxu0 %v75_v54  ;;  %v1072_v62 = vld [vmem:[#allocation2 + $0x1a0] ss:$8 sps:$4 sm:$0xff]   ;;  %v940_v63 = vcombine.low %v153_v60, %v153_v60  ;;  %v1073_v0 = vld [vmem:[#allocation2 + $0x94] ss:$8 sps:$4 sm:$0xff]   ;;  %v941_v13 = vcombine.high %v153_v60, %v153_v60 }
  0x23   :  { %615 = vmatprep.mubr.bf16.mxu1 %v77_v59  ;;  %v1075_v1 = vld [vmem:[#allocation2 + $0x194] ss:$8 sps:$4 sm:$0xff]   ;;  %v1077_v2 = vld [vmem:[#allocation2 + $0x90] ss:$8 sps:$4 sm:$0xff]   ;;  %v1079_v4 = vld [vmem:[#allocation2 + $0x84] ss:$8 sps:$4 sm:$0xff]  }
  0x24   :  { %551 = vmatpush1.bf16.msra.mxu0 %v1023_v22  ;;  %v1078_v3 = vld [vmem:[#allocation2 + $0x190] ss:$8 sps:$4 sm:$0xff]   ;;  %v1081_v5 = vld [vmem:[#allocation2 + $0x184] ss:$8 sps:$4 sm:$0xff]   ;;  %v535_v6 = vsel %vm533_vm0, %v940_v63, 0  ;;  %v1179_v18 = vmov 0  }
  0x25   :  { %594 = vmatpush1.bf16.msra.mxu1 %v1024_v23  ;;  %552 = vmatprep.subr.bf16.mxu0 %v1025_v24  ;;  %v1085_v7 = vld [vmem:[%s1289_s0] ss:$20 sps:$4 sm:$0xff]   ;;  %v1088_v8 = vld [vmem:[%s1289_s0 + $0x28] ss:$20 sps:$4 sm:$0xff]   ;;  %v1094_v10 = vld [vmem:[%s1289_s0 + $0x30] ss:$20 sps:$4 sm:$0xff]  }
  0x26   :  { %595 = vmatprep.subr.bf16.mxu1 %v1027_v25  ;;  %v1091_v9 = vld [vmem:[%s1289_s0 + $0x8] ss:$20 sps:$4 sm:$0xff]   ;;  %v74_v14 = vpack.c.bf16 %v1088_v8, %v1085_v7  ;;  %v1101_v16 = vld [vmem:[#allocation2 + $0x244] ss:$8 sps:$4 sm:$0xff]   ;;  %v1102_v20 = vld [vmem:[#allocation2 + $0x230] ss:$8 sps:$4 sm:$0xff]  }
  0x27   :  { %v1083_v11 = vld [vmem:[#allocation2 + $0x80] ss:$8 sps:$4 sm:$0xff]   ;;  %v76_v15 = vpack.c.bf16 %v1094_v10, %v1091_v9  ;;  %v1104_v19 = vld [vmem:[#allocation2 + $0x234] ss:$8 sps:$4 sm:$0xff]   ;;  %v1107_v21 = vld [vmem:[#allocation2 + $0x224] ss:$8 sps:$4 sm:$0xff]  }
  0x28   :  { %553 = vmatpush1.bf16.msra.mxu0 %v1029_v26  ;;  %v1084_v12 = vld [vmem:[#allocation2 + $0x180] ss:$8 sps:$4 sm:$0xff]   ;;  %v1110_v23 = vld [vmem:[#allocation2 + $0x214] ss:$8 sps:$4 sm:$0xff]   ;;  %v1108_v24 = vld [vmem:[#allocation2 + $0x210] ss:$8 sps:$4 sm:$0xff]  }
  0x29   :  { %596 = vmatpush1.bf16.msra.mxu1 %v1030_v27  ;;  %554 = vmatprep.subr.bf16.mxu0 %v1031_v28  ;;  %v1099_v17 = vld [vmem:[#allocation2 + $0x240] ss:$8 sps:$4 sm:$0xff]   ;;  %v1113_v25 = vld [vmem:[#allocation2 + $0x204] ss:$8 sps:$4 sm:$0xff]   ;;  %vm529_vm1 = vcmask 719872   ;;  %vm846_vm2 = vcmask 523264  }
  0x2a   :  { %597 = vmatprep.subr.bf16.mxu1 %v1033_v29  ;;  %v1105_v22 = vld [vmem:[#allocation2 + $0x220] ss:$8 sps:$4 sm:$0xff]   ;;  %v1114_v26 = vld [vmem:[%s1289_s0 + $0x10] ss:$20 sps:$4 sm:$0xff]   ;;  %v1115_v27 = vld [vmem:[%s1289_s0 + $0x38] ss:$20 sps:$4 sm:$0xff]  }
  0x2b   :  { %v1111_v28 = vld [vmem:[#allocation2 + $0x200] ss:$8 sps:$4 sm:$0xff]   ;;  %v78_v29 = vpack.c.bf16 %v1115_v27, %v1114_v26 }
  0x2c   :  { %555 = vmatpush1.bf16.msra.mxu0 %v1035_v30  ;;  %v1116_v30 = vld [vmem:[%s1291_s2 + $0x78] sm:$0xff]  }
  0x2d   :  { %598 = vmatpush1.bf16.msra.mxu1 %v1036_v31  ;;  %556 = vmatprep.subr.bf16.mxu0 %v1037_v32  ;;  %v1117_v31 = vld [vmem:[%s1291_s2 + $0x38] sm:$0xff]   ;;  %v1118_v32 = vld [vmem:[%s1291_s2 + $0x70] sm:$0xff]  }
  0x2e   :  { %599 = vmatprep.subr.bf16.mxu1 %v1039_v33  ;;  %v1119_v33 = vld [vmem:[%s1291_s2 + $0x30] sm:$0xff]  }
  0x30   :  { %557 = vmatpush2.bf16.msra.mxu0 %v1041_v34  ;;  %v1120_v34 = vld [vmem:[%s1291_s2 + $0x68] sm:$0xff]  }
  0x31   :  { %600 = vmatpush2.bf16.msra.mxu1 %v1042_v35  ;;  %558 = vmatprep.subr.bf16.mxu0 %v1043_v36  ;;  %v1121_v35 = vld [vmem:[%s1291_s2 + $0x28] sm:$0xff]   ;;  %v1122_v36 = vld [vmem:[%s1291_s2 + $0x60] sm:$0xff]  }
  0x32   :  { %601 = vmatprep.subr.bf16.mxu1 %v1045_v37  ;;  %v1123_v37 = vld [vmem:[%s1291_s2 + $0x20] sm:$0xff]  }
  0x34   :  { %559 = vmatpush2.bf16.msra.mxu0 %v1047_v38  ;;  %v1124_v38 = vld [vmem:[%s1291_s2 + $0x58] sm:$0xff]  }
  0x35   :  { %602 = vmatpush2.bf16.msra.mxu1 %v1048_v39  ;;  %560 = vmatprep.subr.bf16.mxu0 %v1049_v40  ;;  %v1125_v39 = vld [vmem:[%s1291_s2 + $0x18] sm:$0xff]   ;;  %v1126_v40 = vld [vmem:[%s1291_s2 + $0x50] sm:$0xff]  }
  0x36   :  { %603 = vmatprep.subr.bf16.mxu1 %v1051_v41  ;;  %v1127_v41 = vld [vmem:[%s1291_s2 + $0x10] sm:$0xff]  }
  0x38   :  { %561 = vmatpush2.bf16.msra.mxu0 %v1053_v42  ;;  %v1128_v42 = vld [vmem:[%s1291_s2 + $0x48] sm:$0xff]  }
  0x39   :  { %604 = vmatpush2.bf16.msra.mxu1 %v1054_v43  ;;  %562 = vmatprep.subr.bf16.mxu0 %v1055_v44  ;;  %v1129_v43 = vld [vmem:[%s1291_s2 + $0x8] sm:$0xff]   ;;  %v1130_v44 = vld [vmem:[%s1291_s2 + $0x40] sm:$0xff]  }
  0x3a   :  { %605 = vmatprep.subr.bf16.mxu1 %v1057_v45  ;;  %v1131_v45 = vld [vmem:[%s1291_s2] sm:$0xff]  }
  0x3c   :  { %563 = vmatpush2.bf16.msra.mxu0 %v1059_v46 }
  0x3d   :  { %606 = vmatpush2.bf16.msra.mxu1 %v1060_v47  ;;  %564 = vmatprep.subr.bf16.mxu0 %v1061_v48 }
  0x3e   :  { %607 = vmatprep.subr.bf16.mxu1 %v1063_v49 }
  0x40   :  { %565 = vmatpush2.bf16.msra.mxu0 %v1065_v52 }
  0x41   :  { %608 = vmatpush2.bf16.msra.mxu1 %v1066_v53  ;;  %566 = vmatprep.subr.bf16.mxu0 %v1067_v57 }
  0x42   :  { %609 = vmatprep.subr.bf16.mxu1 %v1069_v58 }
  0x44   :  { %567 = vmatpush2.bf16.msra.mxu0 %v1071_v61 }
  0x45   :  { %610 = vmatpush2.bf16.msra.mxu1 %v1072_v62  ;;  %568 = vmatprep.subr.bf16.mxu0 %v1073_v0 }
  0x46   :  { %611 = vmatprep.subr.bf16.mxu1 %v1075_v1 }
  0x48   :  { %569 = vmatpush2.bf16.msra.mxu0 %v1077_v2 }
  0x49   :  { %612 = vmatpush2.bf16.msra.mxu1 %v1078_v3  ;;  %570 = vmatprep.subr.bf16.mxu0 %v1079_v4 }
  0x4a   :  { %613 = vmatprep.subr.bf16.mxu1 %v1081_v5 }
  0x4c   :  { %571 = vmatpush2.bf16.msra.mxu0 %v1083_v11 }
  0x4d   :  { %614 = vmatpush2.bf16.msra.mxu1 %v1084_v12  ;;  %942 = vmatprep.subr.msk.bf16.mxu0 %vm533_vm0, %v941_v13 }
  0x4e   :  { %960 = vmatprep.subr.bf16.mxu1 %v1116_v30 }
  0x4f   :  { %573 = vmatmul.mubr.bf16.vlgmr.msra.gmra.mxu0 %v74_v14 }
  0x50   :  { %616 = vmatmul.mubr.bf16.vlgmr.msra.gmra.mxu1 %v76_v15  ;;  %631 = vmatpush1.bf16.msra.mxu0 %v535_v6 }
  0x51   :  { %658 = vmatprep.mubr.bf16.mxu0 %v1179_v18  ;;  %632 = vmatprep.subr.bf16.mxu0 %v1101_v16 }
  0x52   :  { %961 = vmatpush3.bf16.msra.mxu1 %v1117_v31 }
  0x53   :  { %962 = vmatprep.subr.bf16.mxu1 %v1118_v32 }
  0x54   :  { %633 = vmatpush1.bf16.msra.mxu0 %v1099_v17 }
  0x55   :  { %634 = vmatprep.subr.bf16.mxu0 %v1104_v19 }
  0x56   :  { %963 = vmatpush3.bf16.msra.mxu1 %v1119_v33 }
  0x57   :  { %964 = vmatprep.subr.bf16.mxu1 %v1120_v34 }
  0x58   :  { %635 = vmatpush1.bf16.msra.mxu0 %v1102_v20 }
  0x59   :  { %636 = vmatprep.subr.bf16.mxu0 %v1107_v21 }
  0x5a   :  { %965 = vmatpush3.bf16.msra.mxu1 %v1121_v35 }
  0x5b   :  { %966 = vmatprep.subr.bf16.mxu1 %v1122_v36 }
  0x5c   :  { %637 = vmatpush1.bf16.msra.mxu0 %v1105_v22 }
  0x5d   :  { %638 = vmatprep.subr.bf16.mxu0 %v1110_v23 }
  0x5e   :  { %967 = vmatpush3.bf16.msra.mxu1 %v1123_v37 }
  0x5f   :  { %968 = vmatprep.subr.bf16.mxu1 %v1124_v38 }
  0x60   :  { %639 = vmatpush1.bf16.msra.mxu0 %v1108_v24 }
  0x61   :  { %640 = vmatprep.subr.bf16.mxu0 %v1113_v25 }
  0x62   :  { %969 = vmatpush3.bf16.msra.mxu1 %v1125_v39 }
  0x63   :  { %970 = vmatprep.subr.bf16.mxu1 %v1126_v40 }
  0x64   :  { %641 = vmatpush1.bf16.msra.mxu0 %v1111_v28 }
  0x66   :  { %971 = vmatpush3.bf16.msra.mxu1 %v1127_v41 }
  0x67   :  { %943 = vmatmul.mubr.msk.bf16.vlgmr.msra.gmra.mxu0 %vm529_vm1, %v78_v29  ;;  %972 = vmatprep.subr.bf16.mxu1 %v1128_v42 }
  0x6a   :  { %973 = vmatpush3.bf16.msra.mxu1 %v1129_v43 }
  0x6b   :  { %974 = vmatprep.subr.bf16.mxu1 %v1130_v44 }
  0x6e   :  { %975 = vmatpush3.bf16.msra.mxu1 %v1131_v45 }
 0x10f   :  { %v574_v46 = vpop.f32.mrf.mxu0 }
 0x110   :  { %v617_v47 = vpop.f32.mrf.mxu1 }
 0x111   :  { %v576_v48 = vpop.f32.mrf.mxu0  ;;  %v618_v58 = vadd.f32 %v617_v47, %v574_v46 }
 0x112   :  { %v619_v49 = vpop.f32.mrf.mxu1 }
 0x113   :  { %v578_v50 = vpop.f32.mrf.mxu0  ;;  %v620_v56 = vadd.f32 %v619_v49, %v576_v48 }
 0x114   :  { %v621_v51 = vpop.f32.mrf.mxu1 }
 0x115   :  { %v580_v52 = vpop.f32.mrf.mxu0  ;;  %v622_v57 = vadd.f32 %v621_v51, %v578_v50 }
 0x116   :  { %v623_v54 = vpop.f32.mrf.mxu1 }
 0x117   :  { %v624_v60 = vadd.f32 %v623_v54, %v580_v52 }
 0x127   :  { %v660_v53 = vpop.f32.mrf.mxu0 }
 0x128   :  { %v661_v63 = vadd.f32 %v660_v53, %v618_v58 }
 0x129   :  { %v662_v55 = vpop.f32.mrf.mxu0 }
 0x12a   :  { %v663_v61 = vadd.f32 %v662_v55, %v620_v56  ;;  %v669_v5 = vmax.f32 %v661_v63, 0.0 }
 0x12b   :  { %v664_v59 = vpop.f32.mrf.mxu0 }
 0x12c   :  { %v665_v62 = vadd.f32 %v664_v59, %v622_v57  ;;  %v670_v3 = vmax.f32 %v663_v61, 0.0 }
 0x12d   :  { %v666_v0 = vpop.f32.mrf.mxu0 }
 0x12e   :  { %v667_v1 = vadd.f32 %v666_v0, %v624_v60  ;;  %v671_v2 = vmax.f32 %v665_v62, 0.0 }
 0x130   :  { %v672_v4 = vmax.f32 %v667_v1, 0.0  ;;  %v673_v7 = vpack.c.bf16 %v671_v2, %v669_v5 }
 0x132   :  { %v674_v6 = vpack.c.bf16 %v672_v4, %v670_v3 }
 0x134   :  { %835 = vmatprep.mubr.bf16.mxu1 %v674_v6 }
 0x135   :  { %836 = vmatmul.mubr.bf16.vlgmr.msra.gmra.mxu1 %v673_v7 }
 0x1f5   :  { %v976_v8 = vpop.f32.mrf.mxu1 }
 0x1f7   :  { %v977_v9 = vpop.f32.mrf.mxu1 }
 0x1f8   :  { %v978_v10 = vadd.f32 %v977_v9, %v976_v8 }
 0x1f9   :  { %v979_v11 = vpop.f32.mrf.mxu1 }
 0x1fa   :  { %v844_v12 = vmax.f32 %v978_v10, 0.0 }
 0x1fb   :  { %v980_v13 = vpop.f32.mrf.mxu1 }
 0x1fc   :  { %847 = vst.msk [vmem:[#allocation5] sm:$0xff] %vm846_vm2, %v844_v12  ;;  %v981_v14 = vadd.f32 %v980_v13, %v979_v11 }
 0x1fe   :  { %v845_v15 = vmax.f32 %v981_v14, 0.0 }
 0x200   :  { %848 = vst.msk [vmem:[#allocation5 + $0x8] sm:$0xff] %vm846_vm2, %v845_v15 }
 0x201   :  { %853 = vsyncadd [#allocation4], 192  ;;  %s1180_s2 = smov [#allocation5]  }
 0x202   :  { %s854_s14 = sshll.u32 %s1180_s2, 4  ;;  %s855_s14 = int_to_ptr.vmem [resolvable:$true] %s854_s14 }
 0x203   :  { %s1152_s15 = scalar_lea.vmem %s855_s14, 64  ;;  %s1156_s16 = scalar_lea.vmem %s855_s14, 256 }
 0x204   :  { %p1153_p5 = scmp.ne.s32.totalorder %s855_s14, %s1152_s15  ;;  %p1157_p6 = scmp.lt.s32.totalorder %s855_s14, %s855_s14 }
 0x205   :  { %p1158_p7 = scmp.lt.s32.totalorder %s1156_s16, %s1152_s15 }
 0x207   :  { %p1159_p8 = por %p1158_p7, %p1157_p6 }
 0x209   :  { %p1160_p9 = pnand %p1159_p8, %p1153_p5 }
 0x20b   :  { %1163 = shalt.err (!%p1160_p9)
}
 0x20c   :  { %s1181_s0 = smov 64   ;;  %s1182_s17 = smov 4  }
 0x20d   :  { %860 = dma.vmem_to_hbm [thread:$0]  %s855_s14, 64, %s1292_s3, [#allocation4], %s1181_s0, %s1181_s0, %s1182_s17  }
 0x20e   :  { %1174 = dma.done.wait [#allocation4], 256  }
 0x20f   :  { %1175 = vsyncadd [#allocation4], 4294967040 }
 0x210   :  { %864 = vsyncpa [#allocation3], 1 }
 0x211   :  { %865 = vsyncpa [#allocation4], 1 }

</bundles_post_ra>
